<compile_context>
chip_gen: v7x
topology: tpu7x:2x2x1
jax: 0.10.0
libtpu: 0.0.40
codegen_flags: <defaults>
</compile_context>

<pallas_src>
import math
import jax
import jax.numpy as jnp
from jax.experimental import pallas as pl
from jax.experimental.pallas import tpu as pltpu


# --------------------------------------------------------------------------
# Kernel: a batch tile of TB images per grid step, whole Mlp fused.
# --------------------------------------------------------------------------
def mlp_kernel(x_ref, w1_ref, w2_ref, b_ref, o_ref):
    # x_ref : (TB, C, HW)        bf16 activations (channels on sublanes, pixels on lanes)
    # w1_ref: (hidden, C)        bf16 first 1x1 conv weight  (PyTorch weight[:, :, 0, 0])
    # w2_ref: (C_out, hidden)    bf16 second 1x1 conv weight
    # b_ref : (hidden+C_out, 1)  f32 packed biases [b1; b2]
    # o_ref : (TB, C_out, HW)    f32 output
    hidden = w1_ref.shape[0]
    tb = x_ref.shape[0]

    w1 = w1_ref[...]
    w2 = w2_ref[...]
    b = b_ref[...]
    b1 = b[:hidden, :]                         # (hidden, 1) -> broadcast along lanes
    b2 = b[hidden:, :]                         # (C_out, 1)

    def per_image(i, carry):
        x = x_ref[i]                                                    # (C, HW) bf16
        h = jnp.dot(w1, x, preferred_element_type=jnp.float32) + b1     # f32 accum
        h = jnp.maximum(h, 0.0).astype(w2.dtype)                        # ReLU, bf16 for MXU
        y = jnp.dot(w2, h, preferred_element_type=jnp.float32) + b2     # f32 accum
        o_ref[i] = y.astype(o_ref.dtype)
        return carry

    # Only one (hidden, HW) intermediate live at a time -> low vreg pressure.
    jax.lax.fori_loop(0, tb, per_image, 0, unroll=True)


# --------------------------------------------------------------------------
# Wrapper
# --------------------------------------------------------------------------
def _pick_batch_tile(B, C, c_out, HW, vmem_budget_bytes=8 << 20, tb_cap=8):
    # Activation tiles are double-buffered by the pipeline: bf16 in + f32 out.
    per_image = 2 * (C * HW * 2 + c_out * HW * 4)
    tb = max(1, min(B, tb_cap, vmem_budget_bytes // per_image))
    return int(tb)


def _build_pallas_call(B_pad, C, HW, hidden, c_out, tb, single_buffer_weights):
    grid = (B_pad // tb,)
    wkw = {"pipeline_mode": pl.Buffered(1)} if single_buffer_weights else {}

    in_specs = [
        pl.BlockSpec((tb, C, HW), lambda g: (g, 0, 0)),
        pl.BlockSpec((hidden, C), lambda g: (0, 0), **wkw),
        pl.BlockSpec((c_out, hidden), lambda g: (0, 0), **wkw),
        pl.BlockSpec((hidden + c_out, 1), lambda g: (0, 0), **wkw),
    ]
    out_specs = pl.BlockSpec((tb, c_out, HW), lambda g: (g, 0, 0))

    flops = 2 * B_pad * HW * (C * hidden + hidden * c_out)
    bytes_accessed = (B_pad * C * HW * 2            # bf16 input
                      + B_pad * c_out * HW * 4      # f32 output
                      + (hidden * C + c_out * hidden) * 2
                      + (hidden + c_out) * 4)

    return pl.pallas_call(
        mlp_kernel,
        out_shape=jax.ShapeDtypeStruct((B_pad, c_out, HW), jnp.float32),
        grid_spec=pltpu.PrefetchScalarGridSpec(
            num_scalar_prefetch=0,
            grid=grid,
            in_specs=in_specs,
            out_specs=out_specs,
        ),
        compiler_params=pltpu.CompilerParams(
            dimension_semantics=("arbitrary",)),
        cost_estimate=pl.CostEstimate(
            flops=flops, transcendentals=0, bytes_accessed=bytes_accessed),
    )


def mlp_forward(x_nchw, params):
    B, C, H, W = x_nchw.shape
    HW = H * W
    w1 = params['w1'].astype(jnp.bfloat16)
    w2 = params['w2'].astype(jnp.bfloat16)
    b = params['b'].astype(jnp.float32)
    hidden, c_out = w1.shape[0], w2.shape[0]

    # Free reshape: (B, C, H, W) row-major == (B, C, H*W) row-major.
    x = x_nchw.reshape(B, C, HW).astype(jnp.bfloat16)

    # Lane-density guard: keep the last (lane) axis a multiple of 128 so every
    # output store is an unmasked vst.  (HW=256 already satisfies this.)
    HW_pad = ((HW + 127) // 128) * 128
    if HW_pad != HW:
        x = jnp.pad(x, ((0, 0), (0, 0), (0, HW_pad - HW)))

    # Batch tile: amortize per-grid-step overhead and DMA descriptors.
    tb = _pick_batch_tile(B, C, c_out, HW_pad)
    B_pad = ((B + tb - 1) // tb) * tb
    if B_pad != B:
        x = jnp.pad(x, ((0, B_pad - B), (0, 0), (0, 0)))

    try:
        call = _build_pallas_call(B_pad, C, HW_pad, hidden, c_out, tb,
                                  single_buffer_weights=True)
        out = call(x, w1, w2, b)
    except Exception:
        # Fallback for JAX versions where the implicit pallas_call pipeline
        # rejects pipeline_mode=pl.Buffered(1); semantics are identical.
        call = _build_pallas_call(B_pad, C, HW_pad, hidden, c_out, tb,
                                  single_buffer_weights=False)
        out = call(x, w1, w2, b)

    out = out[:B, :, :HW]
    return out.reshape(B, c_out, H, W)


# --------------------------------------------------------------------------
# Parameter init following the module's scheme:
#   gain = (8 * network_depth)^(-1/4), std = gain * sqrt(2 / (fan_in + fan_out)),
#   trunc_normal weights.  (The module zero-inits biases; we randomize them in
#   the test harness below purely to exercise the bias-add path.)
# --------------------------------------------------------------------------
def init_mlp_params(key, in_features, hidden_features, out_features,
                    network_depth, random_bias=False):
    gain = (8.0 * network_depth) ** (-0.25)
    k1, k2, k3 = jax.random.split(key, 3)

    def trunc(k, shape, std):
        return (std * jax.random.truncated_normal(k, -2.0, 2.0, shape)
                ).astype(jnp.float32)

    std1 = gain * math.sqrt(2.0 / float(in_features + hidden_features))
    std2 = gain * math.sqrt(2.0 / float(hidden_features + out_features))
    w1 = trunc(k1, (hidden_features, in_features), std1)
    w2 = trunc(k2, (out_features, hidden_features), std2)
    if random_bias:
        b = (0.1 * jax.random.normal(k3, (hidden_features + out_features, 1))
             ).astype(jnp.float32)
    else:
        b = jnp.zeros((hidden_features + out_features, 1), jnp.float32)
    return dict(w1=w1, w2=w2, b=b)


# --------------------------------------------------------------------------
# Pure-JAX f32 reference (mirrors PyTorch 1x1-conv semantics) for verification.
# Tolerance accounts for bf16 MXU operands (f32 accumulation) in the kernel.
# --------------------------------------------------------------------------
def mlp_ref(x_nchw, params):
    hidden = params['w1'].shape[0]
    b1 = params['b'][:hidden, 0]
    b2 = params['b'][hidden:, 0]
    h = jnp.einsum('oc,bchw->bohw', params['w1'], x_nchw) + b1[None, :, None, None]
    h = jax.nn.relu(h)
    y = jnp.einsum('oc,bchw->bohw', params['w2'], h) + b2[None, :, None, None]
    return y


if __name__ == "__main__":
    key = jax.random.PRNGKey(0)
    B, C, H, W = 2, 16, 16, 16          # NCHW input, in_features = 16
    network_depth = 8
    hidden = int(C * 4.0)               # mlp_ratio = 4.0 -> 64
    out_features = C

    kx, kp = jax.random.split(key)
    x_nchw = jax.random.normal(kx, (B, C, H, W), dtype=jnp.float32)
    # random_bias=True only so the verification exercises the bias add;
    # the module itself zero-inits biases.
    params = init_mlp_params(kp, C, hidden, out_features, network_depth,
                             random_bias=True)

    out = mlp_forward(x_nchw, params)
    out = jax.block_until_ready(out)

    ref = mlp_ref(x_nchw, params)
    max_err = float(jnp.max(jnp.abs(out - ref)))
    assert out.shape == (B, out_features, H, W)
    # bf16 operands / f32 accumulation vs f32 reference.
    assert jnp.allclose(out, ref, rtol=3e-2, atol=3e-2), f"max abs err={max_err}"

    print("KERNEL_OK")
</pallas_src>

<mosaic_0001>
module attributes {stable_mosaic.version = 11 : i64} {
  func.func @mlp_kernel(%arg0: i32, %arg1: memref<2x16x256xbf16, #tpu.memory_space<vmem>>, %arg2: memref<64x16xbf16, #tpu.memory_space<vmem>>, %arg3: memref<16x64xbf16, #tpu.memory_space<vmem>>, %arg4: memref<80x1xf32, #tpu.memory_space<vmem>>, %arg5: memref<2x16x256xf32, #tpu.memory_space<vmem>>) attributes {dimension_semantics = [#tpu.dimension_semantics<arbitrary>], iteration_bounds = array<i64: 1>, scalar_prefetch = 0 : i64, scratch_operands = 0 : i64, tpu.core_type = #tpu.core_type<tc>, window_params = [{transform_indices = @transform_0, window_bounds = array<i64: 2, 16, 256>}, {pipeline_mode = #tpu.pipeline_mode<synchronous>, transform_indices = @transform_1, window_bounds = array<i64: 64, 16>}, {pipeline_mode = #tpu.pipeline_mode<synchronous>, transform_indices = @transform_2, window_bounds = array<i64: 16, 64>}, {pipeline_mode = #tpu.pipeline_mode<synchronous>, transform_indices = @transform_3, window_bounds = array<i64: 80, 1>}, {transform_indices = @transform_4, window_bounds = array<i64: 2, 16, 256>}]} {
    %c0 = arith.constant 0 : index
    %c0_0 = arith.constant 0 : index
    %0 = vector.load %arg2[%c0, %c0_0] : memref<64x16xbf16, #tpu.memory_space<vmem>>, vector<64x16xbf16>
    %c0_1 = arith.constant 0 : index
    %c0_2 = arith.constant 0 : index
    %1 = vector.load %arg3[%c0_1, %c0_2] : memref<16x64xbf16, #tpu.memory_space<vmem>>, vector<16x64xbf16>
    %c0_3 = arith.constant 0 : index
    %c0_4 = arith.constant 0 : index
    %2 = vector.load %arg4[%c0_3, %c0_4] : memref<80x1xf32, #tpu.memory_space<vmem>>, vector<80x1xf32>
    %3 = vector.extract_strided_slice %2 {offsets = [0, 0], sizes = [64, 1], strides = [1, 1]} : vector<80x1xf32> to vector<64x1xf32>
    %4 = vector.extract_strided_slice %2 {offsets = [64, 0], sizes = [16, 1], strides = [1, 1]} : vector<80x1xf32> to vector<16x1xf32>
    %c0_i32 = arith.constant 0 : i32
    %5 = arith.index_cast %c0_i32 : i32 to index
    %c0_5 = arith.constant 0 : index
    %c0_6 = arith.constant 0 : index
    %6 = vector.load %arg1[%5, %c0_5, %c0_6] : memref<2x16x256xbf16, #tpu.memory_space<vmem>>, vector<1x16x256xbf16>
    %7 = vector.shape_cast %6 : vector<1x16x256xbf16> to vector<16x256xbf16>
    %cst = arith.constant dense<0.000000e+00> : vector<64x256xf32>
    %8 = tpu.matmul %0, %7, %cst {dimension_numbers = #tpu.dot_dimension_numbers<[1], [0], [0], [1], [0, 0, 1, 1], [], []>} : vector<64x16xbf16>, vector<16x256xbf16>, vector<64x256xf32> -> vector<64x256xf32>
    %9 = vector.broadcast %3 : vector<64x1xf32> to vector<64x256xf32>
    %10 = arith.addf %8, %9 : vector<64x256xf32>
    %cst_7 = arith.constant 0.000000e+00 : f32
    %11 = vector.broadcast %cst_7 : f32 to vector<64x256xf32>
    %12 = arith.maximumf %10, %11 : vector<64x256xf32>
    %13 = arith.truncf %12 : vector<64x256xf32> to vector<64x256xbf16>
    %cst_8 = arith.constant dense<0.000000e+00> : vector<16x256xf32>
    %14 = tpu.matmul %1, %13, %cst_8 {dimension_numbers = #tpu.dot_dimension_numbers<[1], [0], [0], [1], [0, 0, 1, 1], [], []>} : vector<16x64xbf16>, vector<64x256xbf16>, vector<16x256xf32> -> vector<16x256xf32>
    %15 = vector.broadcast %4 : vector<16x1xf32> to vector<16x256xf32>
    %16 = arith.addf %14, %15 : vector<16x256xf32>
    %17 = arith.index_cast %c0_i32 : i32 to index
    %c0_9 = arith.constant 0 : index
    %c0_10 = arith.constant 0 : index
    %18 = vector.load %arg5[%17, %c0_9, %c0_10] : memref<2x16x256xf32, #tpu.memory_space<vmem>>, vector<1x16x256xf32>
    %19 = vector.shape_cast %18 : vector<1x16x256xf32> to vector<16x256xf32>
    %20 = vector.shape_cast %16 : vector<16x256xf32> to vector<1x16x256xf32>
    tpu.vector_store %arg5[%17, %c0_9, %c0_10], %20 {strides = array<i32>} : memref<2x16x256xf32, #tpu.memory_space<vmem>>, vector<1x16x256xf32>,
    %c1_i32 = arith.constant 1 : i32
    %21 = arith.index_cast %c1_i32 : i32 to index
    %c0_11 = arith.constant 0 : index
    %c0_12 = arith.constant 0 : index
    %22 = vector.load %arg1[%21, %c0_11, %c0_12] : memref<2x16x256xbf16, #tpu.memory_space<vmem>>, vector<1x16x256xbf16>
    %23 = vector.shape_cast %22 : vector<1x16x256xbf16> to vector<16x256xbf16>
    %cst_13 = arith.constant dense<0.000000e+00> : vector<64x256xf32>
    %24 = tpu.matmul %0, %23, %cst_13 {dimension_numbers = #tpu.dot_dimension_numbers<[1], [0], [0], [1], [0, 0, 1, 1], [], []>} : vector<64x16xbf16>, vector<16x256xbf16>, vector<64x256xf32> -> vector<64x256xf32>
    %25 = vector.broadcast %3 : vector<64x1xf32> to vector<64x256xf32>
    %26 = arith.addf %24, %25 : vector<64x256xf32>
    %cst_14 = arith.constant 0.000000e+00 : f32
    %27 = vector.broadcast %cst_14 : f32 to vector<64x256xf32>
    %28 = arith.maximumf %26, %27 : vector<64x256xf32>
    %29 = arith.truncf %28 : vector<64x256xf32> to vector<64x256xbf16>
    %cst_15 = arith.constant dense<0.000000e+00> : vector<16x256xf32>
    %30 = tpu.matmul %1, %29, %cst_15 {dimension_numbers = #tpu.dot_dimension_numbers<[1], [0], [0], [1], [0, 0, 1, 1], [], []>} : vector<16x64xbf16>, vector<64x256xbf16>, vector<16x256xf32> -> vector<16x256xf32>
    %31 = vector.broadcast %4 : vector<16x1xf32> to vector<16x256xf32>
    %32 = arith.addf %30, %31 : vector<16x256xf32>
    %33 = arith.index_cast %c1_i32 : i32 to index
    %c0_16 = arith.constant 0 : index
    %c0_17 = arith.constant 0 : index
    %34 = vector.load %arg5[%33, %c0_16, %c0_17] : memref<2x16x256xf32, #tpu.memory_space<vmem>>, vector<1x16x256xf32>
    %35 = vector.shape_cast %34 : vector<1x16x256xf32> to vector<16x256xf32>
    %36 = vector.shape_cast %32 : vector<16x256xf32> to vector<1x16x256xf32>
    tpu.vector_store %arg5[%33, %c0_16, %c0_17], %36 {strides = array<i32>} : memref<2x16x256xf32, #tpu.memory_space<vmem>>, vector<1x16x256xf32>,
    %c2_i32 = arith.constant 2 : i32
    return
  }
  func.func @transform_0(%arg0: i32) -> (i32, i32, i32) {
    %c0_i32 = arith.constant 0 : i32
    %c0_i32_0 = arith.constant 0 : i32
    %c0_i32_1 = arith.constant 0 : i32
    return %arg0, %c0_i32, %c0_i32_0 : i32, i32, i32
  }
  func.func @transform_1(%arg0: i32) -> (i32, i32) {
    %c0_i32 = arith.constant 0 : i32
    %c0_i32_0 = arith.constant 0 : i32
    %c0_i32_1 = arith.constant 0 : i32
    return %c0_i32, %c0_i32_0 : i32, i32
  }
  func.func @transform_2(%arg0: i32) -> (i32, i32) {
    %c0_i32 = arith.constant 0 : i32
    %c0_i32_0 = arith.constant 0 : i32
    %c0_i32_1 = arith.constant 0 : i32
    return %c0_i32, %c0_i32_0 : i32, i32
  }
  func.func @transform_3(%arg0: i32) -> (i32, i32) {
    %c0_i32 = arith.constant 0 : i32
    %c0_i32_0 = arith.constant 0 : i32
    %c0_i32_1 = arith.constant 0 : i32
    return %c0_i32, %c0_i32_0 : i32, i32
  }
  func.func @transform_4(%arg0: i32) -> (i32, i32, i32) {
    %c0_i32 = arith.constant 0 : i32
    %c0_i32_0 = arith.constant 0 : i32
    %c0_i32_1 = arith.constant 0 : i32
    return %arg0, %c0_i32, %c0_i32_0 : i32, i32, i32
  }
}

module attributes {stable_mosaic.version = 11 : i64} {
  func.func @mlp_kernel(%arg0: i32, %arg1: memref<2x16x256xbf16, #tpu.memory_space<vmem>>, %arg2: memref<64x16xbf16, #tpu.memory_space<vmem>>, %arg3: memref<16x64xbf16, #tpu.memory_space<vmem>>, %arg4: memref<80x1xf32, #tpu.memory_space<vmem>>, %arg5: memref<2x16x256xf32, #tpu.memory_space<vmem>>) attributes {dimension_semantics = [#tpu.dimension_semantics<arbitrary>], iteration_bounds = array<i64: 1>, scalar_prefetch = 0 : i64, scratch_operands = 0 : i64, tpu.core_type = #tpu.core_type<tc>, window_params = [{transform_indices = @transform_0, window_bounds = array<i64: 2, 16, 256>}, {pipeline_mode = #tpu.pipeline_mode<synchronous>, transform_indices = @transform_1, window_bounds = array<i64: 64, 16>}, {pipeline_mode = #tpu.pipeline_mode<synchronous>, transform_indices = @transform_2, window_bounds = array<i64: 16, 64>}, {pipeline_mode = #tpu.pipeline_mode<synchronous>, transform_indices = @transform_3, window_bounds = array<i64: 80, 1>}, {transform_indices = @transform_4, window_bounds = array<i64: 2, 16, 256>}]} {
    %c0 = arith.constant 0 : index
    %c0_0 = arith.constant 0 : index
    %0 = vector.load %arg2[%c0, %c0_0] : memref<64x16xbf16, #tpu.memory_space<vmem>>, vector<64x16xbf16>
    %c0_1 = arith.constant 0 : index
    %c0_2 = arith.constant 0 : index
    %1 = vector.load %arg3[%c0_1, %c0_2] : memref<16x64xbf16, #tpu.memory_space<vmem>>, vector<16x64xbf16>
    %c0_3 = arith.constant 0 : index
    %c0_4 = arith.constant 0 : index
    %2 = vector.load %arg4[%c0_3, %c0_4] : memref<80x1xf32, #tpu.memory_space<vmem>>, vector<80x1xf32>
    %3 = vector.extract_strided_slice %2 {offsets = [0, 0], sizes = [64, 1], strides = [1, 1]} : vector<80x1xf32> to vector<64x1xf32>
    %4 = vector.extract_strided_slice %2 {offsets = [64, 0], sizes = [16, 1], strides = [1, 1]} : vector<80x1xf32> to vector<16x1xf32>
    %c0_i32 = arith.constant 0 : i32
    %5 = arith.index_cast %c0_i32 : i32 to index
    %c0_5 = arith.constant 0 : index
    %c0_6 = arith.constant 0 : index
    %6 = vector.load %arg1[%5, %c0_5, %c0_6] : memref<2x16x256xbf16, #tpu.memory_space<vmem>>, vector<1x16x256xbf16>
    %7 = vector.shape_cast %6 : vector<1x16x256xbf16> to vector<16x256xbf16>
    %cst = arith.constant dense<0.000000e+00> : vector<64x256xf32>
    %8 = tpu.matmul %0, %7, %cst {dimension_numbers = #tpu.dot_dimension_numbers<[1], [0], [0], [1], [0, 0, 1, 1], [], []>} : vector<64x16xbf16>, vector<16x256xbf16>, vector<64x256xf32> -> vector<64x256xf32>
    %9 = vector.broadcast %3 : vector<64x1xf32> to vector<64x256xf32>
    %10 = arith.addf %8, %9 : vector<64x256xf32>
    %cst_7 = arith.constant 0.000000e+00 : f32
    %11 = vector.broadcast %cst_7 : f32 to vector<64x256xf32>
    %12 = arith.maximumf %10, %11 : vector<64x256xf32>
    %13 = arith.truncf %12 : vector<64x256xf32> to vector<64x256xbf16>
    %cst_8 = arith.constant dense<0.000000e+00> : vector<16x256xf32>
    %14 = tpu.matmul %1, %13, %cst_8 {dimension_numbers = #tpu.dot_dimension_numbers<[1], [0], [0], [1], [0, 0, 1, 1], [], []>} : vector<16x64xbf16>, vector<64x256xbf16>, vector<16x256xf32> -> vector<16x256xf32>
    %15 = vector.broadcast %4 : vector<16x1xf32> to vector<16x256xf32>
    %16 = arith.addf %14, %15 : vector<16x256xf32>
    %17 = arith.index_cast %c0_i32 : i32 to index
    %c0_9 = arith.constant 0 : index
    %c0_10 = arith.constant 0 : index
    %18 = vector.load %arg5[%17, %c0_9, %c0_10] : memref<2x16x256xf32, #tpu.memory_space<vmem>>, vector<1x16x256xf32>
    %19 = vector.shape_cast %18 : vector<1x16x256xf32> to vector<16x256xf32>
    %20 = vector.shape_cast %16 : vector<16x256xf32> to vector<1x16x256xf32>
    tpu.vector_store %arg5[%17, %c0_9, %c0_10], %20 {strides = array<i32>} : memref<2x16x256xf32, #tpu.memory_space<vmem>>, vector<1x16x256xf32>,
    %c1_i32 = arith.constant 1 : i32
    %21 = arith.index_cast %c1_i32 : i32 to index
    %c0_11 = arith.constant 0 : index
    %c0_12 = arith.constant 0 : index
    %22 = vector.load %arg1[%21, %c0_11, %c0_12] : memref<2x16x256xbf16, #tpu.memory_space<vmem>>, vector<1x16x256xbf16>
    %23 = vector.shape_cast %22 : vector<1x16x256xbf16> to vector<16x256xbf16>
    %cst_13 = arith.constant dense<0.000000e+00> : vector<64x256xf32>
    %24 = tpu.matmul %0, %23, %cst_13 {dimension_numbers = #tpu.dot_dimension_numbers<[1], [0], [0], [1], [0, 0, 1, 1], [], []>} : vector<64x16xbf16>, vector<16x256xbf16>, vector<64x256xf32> -> vector<64x256xf32>
    %25 = vector.broadcast %3 : vector<64x1xf32> to vector<64x256xf32>
    %26 = arith.addf %24, %25 : vector<64x256xf32>
    %cst_14 = arith.constant 0.000000e+00 : f32
    %27 = vector.broadcast %cst_14 : f32 to vector<64x256xf32>
    %28 = arith.maximumf %26, %27 : vector<64x256xf32>
    %29 = arith.truncf %28 : vector<64x256xf32> to vector<64x256xbf16>
    %cst_15 = arith.constant dense<0.000000e+00> : vector<16x256xf32>
    %30 = tpu.matmul %1, %29, %cst_15 {dimension_numbers = #tpu.dot_dimension_numbers<[1], [0], [0], [1], [0, 0, 1, 1], [], []>} : vector<16x64xbf16>, vector<64x256xbf16>, vector<16x256xf32> -> vector<16x256xf32>
    %31 = vector.broadcast %4 : vector<16x1xf32> to vector<16x256xf32>
    %32 = arith.addf %30, %31 : vector<16x256xf32>
    %33 = arith.index_cast %c1_i32 : i32 to index
    %c0_16 = arith.constant 0 : index
    %c0_17 = arith.constant 0 : index
    %34 = vector.load %arg5[%33, %c0_16, %c0_17] : memref<2x16x256xf32, #tpu.memory_space<vmem>>, vector<1x16x256xf32>
    %35 = vector.shape_cast %34 : vector<1x16x256xf32> to vector<16x256xf32>
    %36 = vector.shape_cast %32 : vector<16x256xf32> to vector<1x16x256xf32>
    tpu.vector_store %arg5[%33, %c0_16, %c0_17], %36 {strides = array<i32>} : memref<2x16x256xf32, #tpu.memory_space<vmem>>, vector<1x16x256xf32>,
    %c2_i32 = arith.constant 2 : i32
    return
  }
  func.func @transform_0(%arg0: i32) -> (i32, i32, i32) {
    %c0_i32 = arith.constant 0 : i32
    %c0_i32_0 = arith.constant 0 : i32
    %c0_i32_1 = arith.constant 0 : i32
    return %arg0, %c0_i32, %c0_i32_0 : i32, i32, i32
  }
  func.func @transform_1(%arg0: i32) -> (i32, i32) {
    %c0_i32 = arith.constant 0 : i32
    %c0_i32_0 = arith.constant 0 : i32
    %c0_i32_1 = arith.constant 0 : i32
    return %c0_i32, %c0_i32_0 : i32, i32
  }
  func.func @transform_2(%arg0: i32) -> (i32, i32) {
    %c0_i32 = arith.constant 0 : i32
    %c0_i32_0 = arith.constant 0 : i32
    %c0_i32_1 = arith.constant 0 : i32
    return %c0_i32, %c0_i32_0 : i32, i32
  }
  func.func @transform_3(%arg0: i32) -> (i32, i32) {
    %c0_i32 = arith.constant 0 : i32
    %c0_i32_0 = arith.constant 0 : i32
    %c0_i32_1 = arith.constant 0 : i32
    return %c0_i32, %c0_i32_0 : i32, i32
  }
  func.func @transform_4(%arg0: i32) -> (i32, i32, i32) {
    %c0_i32 = arith.constant 0 : i32
    %c0_i32_0 = arith.constant 0 : i32
    %c0_i32_1 = arith.constant 0 : i32
    return %arg0, %c0_i32, %c0_i32_0 : i32, i32, i32
  }
}

</mosaic_0001>

<bundles_post_ra>
// kernel: tpu_custom_call.1
= control target key start
LH: loop header
LB: loop body
LE: loop exit
PB: predicated region body
PF: predicated region fallthrough
CT: control target
= control target key end

     0   :  { %v523_v2 = vmov 0   ;;  %vm111_vm0 = vcmask 130048   ;;  %s723_s0 = inlined_call_operand.vmem [shape: bf16[2,16,256], index: 0, kind: input, shape index: {}]   ;;  %s724_s1 = inlined_call_operand.vmem [shape: bf16[64,16], index: 1, kind: input, shape index: {}]   ;;  %s725_s2 = inlined_call_operand.vmem [shape: bf16[16,64], index: 2, kind: input, shape index: {}]   ;;  %s726_s3 = inlined_call_operand.vmem [shape: f32[80,1], index: 3, kind: input, shape index: {}]   ;;  %s727_s4 = inlined_call_operand.hbm [shape: f32[2,16,256], index: 4, kind: output, shape index: {}]  }
   0x1   :  { %v488_v0 = vld [vmem:[%s723_s0 + $0x4] ss:$8 sps:$4 sm:$0xff]   ;;  %v490_v1 = vld [vmem:[%s723_s0] ss:$8 sps:$4 sm:$0xff]   ;;  %156 = vmatprep.mubr.bf16.mxu0 %v523_v2  ;;  %486 = vset.pattern.permute.xlu0 %v523_v2  ;;  %v31_v5 = vld [vmem:[%s726_s3 + $0x10] sm:$0xff] }
   0x2   :  { %124 = vmatprep.subr.bf16.mxu0 %v488_v0  ;;  %v563_v3 = vld [vmem:[%s724_s1] sm:$0xff]   ;;  %487 = vset.pattern.permute.xlu1 %v523_v2  ;;  %v30_v6 = vld [vmem:[%s726_s3 + $0x8] sm:$0xff]  ;;  %v32_v7 = vld [vmem:[%s726_s3 + $0x18] sm:$0xff] }
   0x3   :  { %125 = vmatpush1.bf16.msra.mxu0 %v490_v1  ;;  %272 = vmatprep.mubr.bf16.mxu1 %v523_v2  ;;  %v29_v4 = vld [vmem:[%s726_s3] sm:$0xff]  ;;  %v585_v8 = vld [vmem:[%s724_s1 + $0x8] sm:$0xff]  }
   0x4   :  { %43 = vperm.xlu0 %486, %v29_v4   ;;  %53 = vperm.xlu1 %487, %v31_v5  }
   0x6   :  { %467 = vmatmul.mubr.msk.bf16.vlgmr.msra.gmra.mrb[0].mxu0 %vm111_vm0, %v563_v3 }
   0x7   :  { %166 = vmatprep.mubr.bf16.mxu0 %v523_v2 }
   0x8   :  { %48 = vperm.xlu0 %486, %v30_v6  }
   0x9   :  { %9 = vsyncpa [#allocation3], 0  ;;  %58 = vperm.xlu1 %487, %v32_v7   ;;  %v33_v9 = vld [vmem:[%s726_s3 + $0x20] sm:$0xff]  ;;  %v34_v10 = vld [vmem:[%s726_s3 + $0x28] sm:$0xff]  ;;  %vm236_vm1 = vcmask 523264  }
   0xa   :  { %v35_v11 = vld [vmem:[%s726_s3 + $0x30] sm:$0xff]  ;;  %v36_v12 = vld [vmem:[%s726_s3 + $0x38] sm:$0xff]  ;;  %v37_v14 = vld [vmem:[%s726_s3 + $0x40] sm:$0xff] }
   0xb   :  { %v605_v13 = vld [vmem:[%s724_s1 + $0x10] sm:$0xff]   ;;  %v38_v15 = vld [vmem:[%s726_s3 + $0x48] sm:$0xff]  ;;  %v619_v16 = vld [vmem:[%s724_s1 + $0x18] sm:$0xff]  }
   0xc   :  { %63 = vperm.xlu0 %486, %v33_v9  }
   0xd   :  { %68 = vperm.xlu1 %487, %v34_v10  }
   0xe   :  { %468 = vmatmul.mubr.msk.bf16.gmra.mrb[4].mxu0 %vm111_vm0, %v585_v8 }
   0xf   :  { %176 = vmatprep.mubr.bf16.mxu0 %v523_v2 }
  0x10   :  { %73 = vperm.xlu0 %486, %v35_v11  }
  0x11   :  { %78 = vperm.xlu1 %487, %v36_v12  }
  0x14   :  { %223 = vperm.xlu0 %486, %v37_v14  }
  0x15   :  { %228 = vperm.xlu1 %487, %v38_v15  }
  0x16   :  { %469 = vmatmul.mubr.msk.bf16.gmra.mrb[8].mxu0 %vm111_vm0, %v605_v13 }
  0x17   :  { %186 = vmatprep.mubr.bf16.mxu0 %v523_v2 }
  0x1e   :  { %470 = vmatmul.mubr.msk.bf16.gmra.mrb[12].mxu0 %vm111_vm0, %v619_v16 }
  0x1f   :  { %429 = vmatprep.mubr.bf16.mxu0 %v523_v2 }
  0x83   :  { %v624_v17 = vpop.permute.xlu0 %43  ;;  %v631_v26 = vpop.permute.xlu1 %53 }
  0x87   :  { %v627_v21 = vpop.permute.xlu0 %48 }
  0x88   :  { %v635_v37 = vpop.permute.xlu1 %58 }
  0x8b   :  { %v640_v48 = vpop.permute.xlu0 %63 }
  0x8c   :  { %v643_v53 = vpop.permute.xlu1 %68 }
  0x8f   :  { %v648_v0 = vpop.permute.xlu0 %73 }
  0x90   :  { %v651_v7 = vpop.permute.xlu1 %78 }
  0xd9   :  { %v158_v18 = vpop.f32.mrb[0].mxu0 }
  0xda   :  { %v159_v19 = vadd.f32 %v158_v18, %v624_v17  ;;  %v160_v20 = vpop.f32.mrb[1].mxu0 }
  0xdb   :  { %v161_v22 = vadd.f32 %v160_v20, %v624_v17  ;;  %v162_v23 = vpop.f32.mrb[2].mxu0 }
  0xdc   :  { %v163_v24 = vadd.f32 %v162_v23, %v627_v21  ;;  %v164_v25 = vpop.f32.mrb[3].mxu0  ;;  %v197_v28 = vmax.f32 %v159_v19, 0.0 }
  0xdd   :  { %v165_v27 = vadd.f32 %v164_v25, %v627_v21  ;;  %v198_v30 = vmax.f32 %v161_v22, 0.0  ;;  %v662_v25 = vld [vmem:[%s725_s2] sm:$0xff]  }
  0xde   :  { %v199_v29 = vmax.f32 %v163_v24, 0.0  ;;  %v498_v24 = vld [vmem:[%s723_s0 + $0x14] ss:$8 sps:$4 sm:$0xff]  }
  0xdf   :  { %v200_v31 = vmax.f32 %v165_v27, 0.0  ;;  %v496_v27 = vld [vmem:[%s723_s0 + $0x10] ss:$8 sps:$4 sm:$0xff]   ;;  %s524_s0 = smov [#allocation2]  }
  0xe0   :  { %v213_v32 = vpack.c.bf16 %v199_v29, %v197_v28  ;;  %v681_v28 = vpop.permute.xlu0 %223  ;;  %s450_s2 = sshll.u32 %s524_s0, 4  ;;  %s451_s2 = int_to_ptr.vmem [resolvable:$true] %s450_s2 }
  0xe1   :  { %v168_v33 = vpop.f32.mrb[4].mxu0  ;;  %v214_v34 = vpack.c.bf16 %v200_v31, %v198_v30  ;;  %v684_v31 = vpop.permute.xlu1 %228  ;;  %s499_s25 = scalar_lea.vmem %s451_s2, 1024  ;;  %p504_p1 = scmp.lt.s32.totalorder %s451_s2, %s451_s2 }
  0xe2   :  { %v169_v35 = vadd.f32 %v168_v33, %v631_v26  ;;  %v170_v36 = vpop.f32.mrb[5].mxu0  ;;  %p500_p0 = scmp.ne.s32.totalorder %s451_s2, %s499_s25  ;;  %p505_p2 = scmp.lt.s32.totalorder %s499_s25, %s499_s25 }
  0xe3   :  { %v171_v38 = vadd.f32 %v170_v36, %v631_v26  ;;  %v172_v39 = vpop.f32.mrb[6].mxu0  ;;  %240 = vmatprep.subr.bf16.mxu1 %v214_v34 }
  0xe4   :  { %v173_v40 = vadd.f32 %v172_v39, %v635_v37  ;;  %v174_v41 = vpop.f32.mrb[7].mxu0  ;;  %241 = vmatpush1.bf16.msra.mxu1 %v213_v32  ;;  %v201_v43 = vmax.f32 %v169_v35, 0.0  ;;  %p506_p3 = por %p505_p2, %p504_p1 }
  0xe5   :  { %v175_v42 = vadd.f32 %v174_v41, %v635_v37  ;;  %v202_v45 = vmax.f32 %v171_v38, 0.0 }
  0xe6   :  { %v203_v44 = vmax.f32 %v173_v40, 0.0  ;;  %p507_p4 = pnand %p506_p3, %p500_p0 }
  0xe7   :  { %v204_v46 = vmax.f32 %v175_v42, 0.0 }
  0xe8   :  { %v215_v47 = vpack.c.bf16 %v203_v44, %v201_v43 }
  0xe9   :  { %v216_v49 = vpack.c.bf16 %v204_v46, %v202_v45  ;;  %v178_v50 = vpop.f32.mrb[8].mxu0 }
  0xea   :  { %v179_v51 = vadd.f32 %v178_v50, %v640_v48  ;;  %v180_v52 = vpop.f32.mrb[9].mxu0 }
  0xeb   :  { %v181_v54 = vadd.f32 %v180_v52, %v640_v48  ;;  %v182_v55 = vpop.f32.mrb[10].mxu0  ;;  %242 = vmatprep.subr.bf16.mxu1 %v216_v49 }
  0xec   :  { %v183_v56 = vadd.f32 %v182_v55, %v643_v53  ;;  %v184_v57 = vpop.f32.mrb[11].mxu0  ;;  %243 = vmatpush1.bf16.msra.mxu1 %v215_v47  ;;  %v205_v59 = vmax.f32 %v179_v51, 0.0 }
  0xed   :  { %v185_v58 = vadd.f32 %v184_v57, %v643_v53  ;;  %v206_v61 = vmax.f32 %v181_v54, 0.0 }
  0xee   :  { %v207_v60 = vmax.f32 %v183_v56, 0.0 }
  0xef   :  { %v208_v62 = vmax.f32 %v185_v58, 0.0 }
  0xf0   :  { %v217_v63 = vpack.c.bf16 %v207_v60, %v205_v59 }
  0xf1   :  { %v218_v1 = vpack.c.bf16 %v208_v62, %v206_v61  ;;  %v188_v4 = vpop.f32.mrb[12].mxu0 }
  0xf2   :  { %v189_v5 = vadd.f32 %v188_v4, %v648_v0  ;;  %v190_v6 = vpop.f32.mrb[13].mxu0 }
  0xf3   :  { %v191_v9 = vadd.f32 %v190_v6, %v648_v0  ;;  %v192_v10 = vpop.f32.mrb[14].mxu0  ;;  %244 = vmatprep.subr.bf16.mxu1 %v218_v1 }
  0xf4   :  { %v193_v11 = vadd.f32 %v192_v10, %v651_v7  ;;  %v194_v12 = vpop.f32.mrb[15].mxu0  ;;  %245 = vmatpush1.bf16.msra.mxu1 %v217_v63  ;;  %v209_v15 = vmax.f32 %v189_v5, 0.0 }
  0xf5   :  { %v195_v14 = vadd.f32 %v194_v12, %v651_v7  ;;  %v210_v19 = vmax.f32 %v191_v9, 0.0 }
  0xf6   :  { %v211_v18 = vmax.f32 %v193_v11, 0.0 }
  0xf7   :  { %v212_v20 = vmax.f32 %v195_v14, 0.0 }
  0xf8   :  { %v219_v22 = vpack.c.bf16 %v211_v18, %v209_v15 }
  0xf9   :  { %v220_v23 = vpack.c.bf16 %v212_v20, %v210_v19 }
  0xfb   :  { %246 = vmatprep.subr.bf16.mxu1 %v220_v23 }
  0xfc   :  { %247 = vmatpush1.bf16.msra.mxu1 %v219_v22 }
  0xfd   :  { %300 = vmatprep.subr.bf16.mxu1 %v498_v24 }
  0xff   :  { %472 = vmatmul.mubr.msk.bf16.vlgmr.msra.gmra.mrb[0].mxu1 %vm236_vm1, %v662_v25 }
 0x100   :  { %301 = vmatpush1.bf16.msra.mxu1 %v496_v27  ;;  %332 = vmatprep.mubr.bf16.mxu1 %v523_v2 }
 0x107   :  { %477 = vmatmul.mubr.msk.bf16.vlgmr.msra.gmra.mrb[4].mxu1 %vm111_vm0, %v563_v3 }
 0x108   :  { %342 = vmatprep.mubr.bf16.mxu1 %v523_v2 }
 0x10f   :  { %478 = vmatmul.mubr.msk.bf16.gmra.mrb[8].mxu1 %vm111_vm0, %v585_v8 }
 0x110   :  { %352 = vmatprep.mubr.bf16.mxu1 %v523_v2 }
 0x117   :  { %479 = vmatmul.mubr.msk.bf16.gmra.mrb[12].mxu1 %vm111_vm0, %v605_v13 }
 0x118   :  { %362 = vmatprep.mubr.bf16.mxu1 %v523_v2 }
 0x11f   :  { %480 = vmatmul.mubr.msk.bf16.gmra.mrb[16].mxu1 %vm111_vm0, %v619_v16 }
 0x1d2   :  { %v274_v29 = vpop.f32.mrb[0].mxu1 }
 0x1d3   :  { %v275_v3 = vadd.f32 %v274_v29, %v681_v28  ;;  %v276_v30 = vpop.f32.mrb[1].mxu1 }
 0x1d4   :  { %v277_v8 = vadd.f32 %v276_v30, %v681_v28  ;;  %v278_v32 = vpop.f32.mrb[2].mxu1 }
 0x1d5   :  { %283 = vst [vmem:[#allocation2] sm:$0xff] %v275_v3  ;;  %v279_v33 = vadd.f32 %v278_v32, %v684_v31  ;;  %v280_v13 = vpop.f32.mrb[3].mxu1 }
 0x1d6   :  { %284 = vst [vmem:[#allocation2 + $0x8] sm:$0xff] %v277_v8  ;;  %v281_v2 = vadd.f32 %v280_v13, %v684_v31 }
 0x1d7   :  { %285 = vst [vmem:[#allocation2 + $0x10] sm:$0xff] %v279_v33 }
 0x1d8   :  { %286 = vst [vmem:[#allocation2 + $0x18] sm:$0xff] %v281_v2 }
 0x1da   :  { %v334_v16 = vpop.f32.mrb[4].mxu1 }
 0x1db   :  { %v335_v34 = vadd.f32 %v334_v16, %v624_v17  ;;  %v336_v35 = vpop.f32.mrb[5].mxu1 }
 0x1dc   :  { %v337_v36 = vadd.f32 %v336_v35, %v624_v17  ;;  %v338_v38 = vpop.f32.mrb[6].mxu1 }
 0x1dd   :  { %v339_v39 = vadd.f32 %v338_v38, %v627_v21  ;;  %v340_v40 = vpop.f32.mrb[7].mxu1  ;;  %v373_v42 = vmax.f32 %v335_v34, 0.0 }
 0x1de   :  { %v341_v41 = vadd.f32 %v340_v40, %v627_v21  ;;  %v374_v44 = vmax.f32 %v337_v36, 0.0 }
 0x1df   :  { %v375_v43 = vmax.f32 %v339_v39, 0.0 }
 0x1e0   :  { %v376_v45 = vmax.f32 %v341_v41, 0.0 }
 0x1e1   :  { %v389_v46 = vpack.c.bf16 %v375_v43, %v373_v42 }
 0x1e2   :  { %v390_v47 = vpack.c.bf16 %v376_v45, %v374_v44  ;;  %v344_v49 = vpop.f32.mrb[8].mxu1 }
 0x1e3   :  { %v345_v50 = vadd.f32 %v344_v49, %v631_v26  ;;  %v346_v51 = vpop.f32.mrb[9].mxu1 }
 0x1e4   :  { %v347_v52 = vadd.f32 %v346_v51, %v631_v26  ;;  %v348_v54 = vpop.f32.mrb[10].mxu1  ;;  %397 = vmatprep.subr.bf16.mxu0 %v390_v47 }
 0x1e5   :  { %v349_v17 = vadd.f32 %v348_v54, %v635_v37  ;;  %v350_v55 = vpop.f32.mrb[11].mxu1  ;;  %398 = vmatpush1.bf16.msra.mxu0 %v389_v46  ;;  %v377_v56 = vmax.f32 %v345_v50, 0.0 }
 0x1e6   :  { %v351_v21 = vadd.f32 %v350_v55, %v635_v37  ;;  %v378_v58 = vmax.f32 %v347_v52, 0.0 }
 0x1e7   :  { %v379_v57 = vmax.f32 %v349_v17, 0.0 }
 0x1e8   :  { %v380_v59 = vmax.f32 %v351_v21, 0.0 }
 0x1e9   :  { %v391_v60 = vpack.c.bf16 %v379_v57, %v377_v56 }
 0x1ea   :  { %v392_v61 = vpack.c.bf16 %v380_v59, %v378_v58  ;;  %v354_v62 = vpop.f32.mrb[12].mxu1 }
 0x1eb   :  { %v355_v63 = vadd.f32 %v354_v62, %v640_v48  ;;  %v356_v1 = vpop.f32.mrb[13].mxu1 }
 0x1ec   :  { %v357_v26 = vadd.f32 %v356_v1, %v640_v48  ;;  %v358_v4 = vpop.f32.mrb[14].mxu1  ;;  %399 = vmatprep.subr.bf16.mxu0 %v392_v61 }
 0x1ed   :  { %v359_v5 = vadd.f32 %v358_v4, %v643_v53  ;;  %v360_v6 = vpop.f32.mrb[15].mxu1  ;;  %400 = vmatpush1.bf16.msra.mxu0 %v391_v60  ;;  %v381_v9 = vmax.f32 %v355_v63, 0.0 }
 0x1ee   :  { %v361_v37 = vadd.f32 %v360_v6, %v643_v53  ;;  %v382_v11 = vmax.f32 %v357_v26, 0.0 }
 0x1ef   :  { %v383_v10 = vmax.f32 %v359_v5, 0.0 }
 0x1f0   :  { %v384_v12 = vmax.f32 %v361_v37, 0.0 }
 0x1f1   :  { %v393_v14 = vpack.c.bf16 %v383_v10, %v381_v9 }
 0x1f2   :  { %v394_v15 = vpack.c.bf16 %v384_v12, %v382_v11  ;;  %v364_v18 = vpop.f32.mrb[16].mxu1 }
 0x1f3   :  { %v365_v19 = vadd.f32 %v364_v18, %v648_v0  ;;  %v366_v20 = vpop.f32.mrb[17].mxu1 }
 0x1f4   :  { %v367_v48 = vadd.f32 %v366_v20, %v648_v0  ;;  %v368_v22 = vpop.f32.mrb[18].mxu1  ;;  %401 = vmatprep.subr.bf16.mxu0 %v394_v15 }
 0x1f5   :  { %v369_v23 = vadd.f32 %v368_v22, %v651_v7  ;;  %v370_v24 = vpop.f32.mrb[19].mxu1  ;;  %402 = vmatpush1.bf16.msra.mxu0 %v393_v14  ;;  %v385_v27 = vmax.f32 %v365_v19, 0.0 }
 0x1f6   :  { %v371_v53 = vadd.f32 %v370_v24, %v651_v7  ;;  %v386_v3 = vmax.f32 %v367_v48, 0.0 }
 0x1f7   :  { %v387_v29 = vmax.f32 %v369_v23, 0.0 }
 0x1f8   :  { %v388_v30 = vmax.f32 %v371_v53, 0.0 }
 0x1f9   :  { %v395_v8 = vpack.c.bf16 %v387_v29, %v385_v27 }
 0x1fa   :  { %v396_v32 = vpack.c.bf16 %v388_v30, %v386_v3 }
 0x1fc   :  { %403 = vmatprep.subr.bf16.mxu0 %v396_v32 }
 0x1fd   :  { %404 = vmatpush1.bf16.msra.mxu0 %v395_v8 }
 0x200   :  { %481 = vmatmul.mubr.msk.bf16.vlgmr.msra.gmra.mrb[16].mxu0 %vm236_vm1, %v662_v25 }
 0x2d3   :  { %v431_v0 = vpop.f32.mrb[16].mxu0 }
 0x2d4   :  { %v432_v33 = vadd.f32 %v431_v0, %v681_v28  ;;  %v433_v13 = vpop.f32.mrb[17].mxu0 }
 0x2d5   :  { %v434_v2 = vadd.f32 %v433_v13, %v681_v28  ;;  %v435_v7 = vpop.f32.mrb[18].mxu0 }
 0x2d6   :  { %441 = vst [vmem:[#allocation2 + $0x20] sm:$0xff] %v432_v33  ;;  %v436_v16 = vadd.f32 %v435_v7, %v684_v31  ;;  %v437_v34 = vpop.f32.mrb[19].mxu0 }
 0x2d7   :  { %442 = vst [vmem:[#allocation2 + $0x28] sm:$0xff] %v434_v2  ;;  %v438_v35 = vadd.f32 %v437_v34, %v684_v31 }
 0x2d8   :  { %443 = vst [vmem:[#allocation2 + $0x30] sm:$0xff] %v436_v16 }
 0x2d9   :  { %444 = vst [vmem:[#allocation2 + $0x38] sm:$0xff] %v438_v35 }
 0x2da   :  { %510 = shalt.err (!%p507_p4)
}
 0x2db   :  { %s511_s28 = scalar_lea.hbm %s727_s4, 1024 }
 0x2dc   :  { %p512_p5 = scmp.ne.s32.totalorder %s727_s4, %s511_s28  ;;  %p515_p6 = scmp.lt.u32.totalorder %s511_s28, %s727_s4 }
 0x2de   :  { %p517_p7 = pnand %p515_p6, %p512_p5 }
 0x2e0   :  { %520 = shalt.err (!%p517_p7)
}
 0x2e1   :  { %s525_s7 = smov 256   ;;  %s526_s8 = smov 16  }
 0x2e2   :  { %456 = dma.vmem_to_hbm [thread:$0]  %s451_s2, 1024, %s727_s4, [#allocation3], %s525_s7, %s525_s7, %s526_s8  }
 0x2e3   :  { %521 = dma.done.wait [#allocation3], 1024  }
 0x2e4   :  { %522 = vsyncadd [#allocation3], 4294966272 }
 0x2e5   :  { %460 = vsyncpa [#allocation3], 1 }

// kernel: tpu_custom_call.1
= control target key start
LH: loop header
LB: loop body
LE: loop exit
PB: predicated region body
PF: predicated region fallthrough
CT: control target
= control target key end

     0   :  { %v523_v2 = vmov 0   ;;  %vm111_vm0 = vcmask 130048   ;;  %s723_s0 = inlined_call_operand.vmem [shape: bf16[2,16,256], index: 0, kind: input, shape index: {}]   ;;  %s724_s1 = inlined_call_operand.vmem [shape: bf16[64,16], index: 1, kind: input, shape index: {}]   ;;  %s725_s2 = inlined_call_operand.vmem [shape: bf16[16,64], index: 2, kind: input, shape index: {}]   ;;  %s726_s3 = inlined_call_operand.vmem [shape: f32[80,1], index: 3, kind: input, shape index: {}]   ;;  %s727_s4 = inlined_call_operand.hbm [shape: f32[2,16,256], index: 4, kind: output, shape index: {}]  }
   0x1   :  { %v488_v0 = vld [vmem:[%s723_s0 + $0x4] ss:$8 sps:$4 sm:$0xff]   ;;  %v490_v1 = vld [vmem:[%s723_s0] ss:$8 sps:$4 sm:$0xff]   ;;  %156 = vmatprep.mubr.bf16.mxu0 %v523_v2  ;;  %486 = vset.pattern.permute.xlu0 %v523_v2  ;;  %v31_v5 = vld [vmem:[%s726_s3 + $0x10] sm:$0xff] }
   0x2   :  { %124 = vmatprep.subr.bf16.mxu0 %v488_v0  ;;  %v563_v3 = vld [vmem:[%s724_s1] sm:$0xff]   ;;  %487 = vset.pattern.permute.xlu1 %v523_v2  ;;  %v30_v6 = vld [vmem:[%s726_s3 + $0x8] sm:$0xff]  ;;  %v32_v7 = vld [vmem:[%s726_s3 + $0x18] sm:$0xff] }
   0x3   :  { %125 = vmatpush1.bf16.msra.mxu0 %v490_v1  ;;  %272 = vmatprep.mubr.bf16.mxu1 %v523_v2  ;;  %v29_v4 = vld [vmem:[%s726_s3] sm:$0xff]  ;;  %v585_v8 = vld [vmem:[%s724_s1 + $0x8] sm:$0xff]  }
   0x4   :  { %43 = vperm.xlu0 %486, %v29_v4   ;;  %53 = vperm.xlu1 %487, %v31_v5  }
   0x6   :  { %467 = vmatmul.mubr.msk.bf16.vlgmr.msra.gmra.mrb[0].mxu0 %vm111_vm0, %v563_v3 }
   0x7   :  { %166 = vmatprep.mubr.bf16.mxu0 %v523_v2 }
   0x8   :  { %48 = vperm.xlu0 %486, %v30_v6  }
   0x9   :  { %9 = vsyncpa [#allocation3], 0  ;;  %58 = vperm.xlu1 %487, %v32_v7   ;;  %v33_v9 = vld [vmem:[%s726_s3 + $0x20] sm:$0xff]  ;;  %v34_v10 = vld [vmem:[%s726_s3 + $0x28] sm:$0xff]  ;;  %vm236_vm1 = vcmask 523264  }
   0xa   :  { %v35_v11 = vld [vmem:[%s726_s3 + $0x30] sm:$0xff]  ;;  %v36_v12 = vld [vmem:[%s726_s3 + $0x38] sm:$0xff]  ;;  %v37_v14 = vld [vmem:[%s726_s3 + $0x40] sm:$0xff] }
   0xb   :  { %v605_v13 = vld [vmem:[%s724_s1 + $0x10] sm:$0xff]   ;;  %v38_v15 = vld [vmem:[%s726_s3 + $0x48] sm:$0xff]  ;;  %v619_v16 = vld [vmem:[%s724_s1 + $0x18] sm:$0xff]  }
   0xc   :  { %63 = vperm.xlu0 %486, %v33_v9  }
   0xd   :  { %68 = vperm.xlu1 %487, %v34_v10  }
   0xe   :  { %468 = vmatmul.mubr.msk.bf16.gmra.mrb[4].mxu0 %vm111_vm0, %v585_v8 }
   0xf   :  { %176 = vmatprep.mubr.bf16.mxu0 %v523_v2 }
  0x10   :  { %73 = vperm.xlu0 %486, %v35_v11  }
  0x11   :  { %78 = vperm.xlu1 %487, %v36_v12  }
  0x14   :  { %223 = vperm.xlu0 %486, %v37_v14  }
  0x15   :  { %228 = vperm.xlu1 %487, %v38_v15  }
  0x16   :  { %469 = vmatmul.mubr.msk.bf16.gmra.mrb[8].mxu0 %vm111_vm0, %v605_v13 }
  0x17   :  { %186 = vmatprep.mubr.bf16.mxu0 %v523_v2 }
  0x1e   :  { %470 = vmatmul.mubr.msk.bf16.gmra.mrb[12].mxu0 %vm111_vm0, %v619_v16 }
  0x1f   :  { %429 = vmatprep.mubr.bf16.mxu0 %v523_v2 }
  0x83   :  { %v624_v17 = vpop.permute.xlu0 %43  ;;  %v631_v26 = vpop.permute.xlu1 %53 }
  0x87   :  { %v627_v21 = vpop.permute.xlu0 %48 }
  0x88   :  { %v635_v37 = vpop.permute.xlu1 %58 }
  0x8b   :  { %v640_v48 = vpop.permute.xlu0 %63 }
  0x8c   :  { %v643_v53 = vpop.permute.xlu1 %68 }
  0x8f   :  { %v648_v0 = vpop.permute.xlu0 %73 }
  0x90   :  { %v651_v7 = vpop.permute.xlu1 %78 }
  0xd9   :  { %v158_v18 = vpop.f32.mrb[0].mxu0 }
  0xda   :  { %v159_v19 = vadd.f32 %v158_v18, %v624_v17  ;;  %v160_v20 = vpop.f32.mrb[1].mxu0 }
  0xdb   :  { %v161_v22 = vadd.f32 %v160_v20, %v624_v17  ;;  %v162_v23 = vpop.f32.mrb[2].mxu0 }
  0xdc   :  { %v163_v24 = vadd.f32 %v162_v23, %v627_v21  ;;  %v164_v25 = vpop.f32.mrb[3].mxu0  ;;  %v197_v28 = vmax.f32 %v159_v19, 0.0 }
  0xdd   :  { %v165_v27 = vadd.f32 %v164_v25, %v627_v21  ;;  %v198_v30 = vmax.f32 %v161_v22, 0.0  ;;  %v662_v25 = vld [vmem:[%s725_s2] sm:$0xff]  }
  0xde   :  { %v199_v29 = vmax.f32 %v163_v24, 0.0  ;;  %v498_v24 = vld [vmem:[%s723_s0 + $0x14] ss:$8 sps:$4 sm:$0xff]  }
  0xdf   :  { %v200_v31 = vmax.f32 %v165_v27, 0.0  ;;  %v496_v27 = vld [vmem:[%s723_s0 + $0x10] ss:$8 sps:$4 sm:$0xff]   ;;  %s524_s0 = smov [#allocation2]  }
  0xe0   :  { %v213_v32 = vpack.c.bf16 %v199_v29, %v197_v28  ;;  %v681_v28 = vpop.permute.xlu0 %223  ;;  %s450_s2 = sshll.u32 %s524_s0, 4  ;;  %s451_s2 = int_to_ptr.vmem [resolvable:$true] %s450_s2 }
  0xe1   :  { %v168_v33 = vpop.f32.mrb[4].mxu0  ;;  %v214_v34 = vpack.c.bf16 %v200_v31, %v198_v30  ;;  %v684_v31 = vpop.permute.xlu1 %228  ;;  %s499_s25 = scalar_lea.vmem %s451_s2, 1024  ;;  %p504_p1 = scmp.lt.s32.totalorder %s451_s2, %s451_s2 }
  0xe2   :  { %v169_v35 = vadd.f32 %v168_v33, %v631_v26  ;;  %v170_v36 = vpop.f32.mrb[5].mxu0  ;;  %p500_p0 = scmp.ne.s32.totalorder %s451_s2, %s499_s25  ;;  %p505_p2 = scmp.lt.s32.totalorder %s499_s25, %s499_s25 }
  0xe3   :  { %v171_v38 = vadd.f32 %v170_v36, %v631_v26  ;;  %v172_v39 = vpop.f32.mrb[6].mxu0  ;;  %240 = vmatprep.subr.bf16.mxu1 %v214_v34 }
  0xe4   :  { %v173_v40 = vadd.f32 %v172_v39, %v635_v37  ;;  %v174_v41 = vpop.f32.mrb[7].mxu0  ;;  %241 = vmatpush1.bf16.msra.mxu1 %v213_v32  ;;  %v201_v43 = vmax.f32 %v169_v35, 0.0  ;;  %p506_p3 = por %p505_p2, %p504_p1 }
  0xe5   :  { %v175_v42 = vadd.f32 %v174_v41, %v635_v37  ;;  %v202_v45 = vmax.f32 %v171_v38, 0.0 }
  0xe6   :  { %v203_v44 = vmax.f32 %v173_v40, 0.0  ;;  %p507_p4 = pnand %p506_p3, %p500_p0 }
  0xe7   :  { %v204_v46 = vmax.f32 %v175_v42, 0.0 }
  0xe8   :  { %v215_v47 = vpack.c.bf16 %v203_v44, %v201_v43 }
  0xe9   :  { %v216_v49 = vpack.c.bf16 %v204_v46, %v202_v45  ;;  %v178_v50 = vpop.f32.mrb[8].mxu0 }
  0xea   :  { %v179_v51 = vadd.f32 %v178_v50, %v640_v48  ;;  %v180_v52 = vpop.f32.mrb[9].mxu0 }
  0xeb   :  { %v181_v54 = vadd.f32 %v180_v52, %v640_v48  ;;  %v182_v55 = vpop.f32.mrb[10].mxu0  ;;  %242 = vmatprep.subr.bf16.mxu1 %v216_v49 }
  0xec   :  { %v183_v56 = vadd.f32 %v182_v55, %v643_v53  ;;  %v184_v57 = vpop.f32.mrb[11].mxu0  ;;  %243 = vmatpush1.bf16.msra.mxu1 %v215_v47  ;;  %v205_v59 = vmax.f32 %v179_v51, 0.0 }
  0xed   :  { %v185_v58 = vadd.f32 %v184_v57, %v643_v53  ;;  %v206_v61 = vmax.f32 %v181_v54, 0.0 }
  0xee   :  { %v207_v60 = vmax.f32 %v183_v56, 0.0 }
  0xef   :  { %v208_v62 = vmax.f32 %v185_v58, 0.0 }
  0xf0   :  { %v217_v63 = vpack.c.bf16 %v207_v60, %v205_v59 }
  0xf1   :  { %v218_v1 = vpack.c.bf16 %v208_v62, %v206_v61  ;;  %v188_v4 = vpop.f32.mrb[12].mxu0 }
  0xf2   :  { %v189_v5 = vadd.f32 %v188_v4, %v648_v0  ;;  %v190_v6 = vpop.f32.mrb[13].mxu0 }
  0xf3   :  { %v191_v9 = vadd.f32 %v190_v6, %v648_v0  ;;  %v192_v10 = vpop.f32.mrb[14].mxu0  ;;  %244 = vmatprep.subr.bf16.mxu1 %v218_v1 }
  0xf4   :  { %v193_v11 = vadd.f32 %v192_v10, %v651_v7  ;;  %v194_v12 = vpop.f32.mrb[15].mxu0  ;;  %245 = vmatpush1.bf16.msra.mxu1 %v217_v63  ;;  %v209_v15 = vmax.f32 %v189_v5, 0.0 }
  0xf5   :  { %v195_v14 = vadd.f32 %v194_v12, %v651_v7  ;;  %v210_v19 = vmax.f32 %v191_v9, 0.0 }
  0xf6   :  { %v211_v18 = vmax.f32 %v193_v11, 0.0 }
  0xf7   :  { %v212_v20 = vmax.f32 %v195_v14, 0.0 }
  0xf8   :  { %v219_v22 = vpack.c.bf16 %v211_v18, %v209_v15 }
  0xf9   :  { %v220_v23 = vpack.c.bf16 %v212_v20, %v210_v19 }
  0xfb   :  { %246 = vmatprep.subr.bf16.mxu1 %v220_v23 }
  0xfc   :  { %247 = vmatpush1.bf16.msra.mxu1 %v219_v22 }
  0xfd   :  { %300 = vmatprep.subr.bf16.mxu1 %v498_v24 }
  0xff   :  { %472 = vmatmul.mubr.msk.bf16.vlgmr.msra.gmra.mrb[0].mxu1 %vm236_vm1, %v662_v25 }
 0x100   :  { %301 = vmatpush1.bf16.msra.mxu1 %v496_v27  ;;  %332 = vmatprep.mubr.bf16.mxu1 %v523_v2 }
 0x107   :  { %477 = vmatmul.mubr.msk.bf16.vlgmr.msra.gmra.mrb[4].mxu1 %vm111_vm0, %v563_v3 }
 0x108   :  { %342 = vmatprep.mubr.bf16.mxu1 %v523_v2 }
 0x10f   :  { %478 = vmatmul.mubr.msk.bf16.gmra.mrb[8].mxu1 %vm111_vm0, %v585_v8 }
 0x110   :  { %352 = vmatprep.mubr.bf16.mxu1 %v523_v2 }
 0x117   :  { %479 = vmatmul.mubr.msk.bf16.gmra.mrb[12].mxu1 %vm111_vm0, %v605_v13 }
 0x118   :  { %362 = vmatprep.mubr.bf16.mxu1 %v523_v2 }
 0x11f   :  { %480 = vmatmul.mubr.msk.bf16.gmra.mrb[16].mxu1 %vm111_vm0, %v619_v16 }
 0x1d2   :  { %v274_v29 = vpop.f32.mrb[0].mxu1 }
 0x1d3   :  { %v275_v3 = vadd.f32 %v274_v29, %v681_v28  ;;  %v276_v30 = vpop.f32.mrb[1].mxu1 }
 0x1d4   :  { %v277_v8 = vadd.f32 %v276_v30, %v681_v28  ;;  %v278_v32 = vpop.f32.mrb[2].mxu1 }
 0x1d5   :  { %283 = vst [vmem:[#allocation2] sm:$0xff] %v275_v3  ;;  %v279_v33 = vadd.f32 %v278_v32, %v684_v31  ;;  %v280_v13 = vpop.f32.mrb[3].mxu1 }
 0x1d6   :  { %284 = vst [vmem:[#allocation2 + $0x8] sm:$0xff] %v277_v8  ;;  %v281_v2 = vadd.f32 %v280_v13, %v684_v31 }
 0x1d7   :  { %285 = vst [vmem:[#allocation2 + $0x10] sm:$0xff] %v279_v33 }
 0x1d8   :  { %286 = vst [vmem:[#allocation2 + $0x18] sm:$0xff] %v281_v2 }
 0x1da   :  { %v334_v16 = vpop.f32.mrb[4].mxu1 }
 0x1db   :  { %v335_v34 = vadd.f32 %v334_v16, %v624_v17  ;;  %v336_v35 = vpop.f32.mrb[5].mxu1 }
 0x1dc   :  { %v337_v36 = vadd.f32 %v336_v35, %v624_v17  ;;  %v338_v38 = vpop.f32.mrb[6].mxu1 }
 0x1dd   :  { %v339_v39 = vadd.f32 %v338_v38, %v627_v21  ;;  %v340_v40 = vpop.f32.mrb[7].mxu1  ;;  %v373_v42 = vmax.f32 %v335_v34, 0.0 }
 0x1de   :  { %v341_v41 = vadd.f32 %v340_v40, %v627_v21  ;;  %v374_v44 = vmax.f32 %v337_v36, 0.0 }
 0x1df   :  { %v375_v43 = vmax.f32 %v339_v39, 0.0 }
 0x1e0   :  { %v376_v45 = vmax.f32 %v341_v41, 0.0 }
 0x1e1   :  { %v389_v46 = vpack.c.bf16 %v375_v43, %v373_v42 }
 0x1e2   :  { %v390_v47 = vpack.c.bf16 %v376_v45, %v374_v44  ;;  %v344_v49 = vpop.f32.mrb[8].mxu1 }
 0x1e3   :  { %v345_v50 = vadd.f32 %v344_v49, %v631_v26  ;;  %v346_v51 = vpop.f32.mrb[9].mxu1 }
 0x1e4   :  { %v347_v52 = vadd.f32 %v346_v51, %v631_v26  ;;  %v348_v54 = vpop.f32.mrb[10].mxu1  ;;  %397 = vmatprep.subr.bf16.mxu0 %v390_v47 }
 0x1e5   :  { %v349_v17 = vadd.f32 %v348_v54, %v635_v37  ;;  %v350_v55 = vpop.f32.mrb[11].mxu1  ;;  %398 = vmatpush1.bf16.msra.mxu0 %v389_v46  ;;  %v377_v56 = vmax.f32 %v345_v50, 0.0 }
 0x1e6   :  { %v351_v21 = vadd.f32 %v350_v55, %v635_v37  ;;  %v378_v58 = vmax.f32 %v347_v52, 0.0 }
 0x1e7   :  { %v379_v57 = vmax.f32 %v349_v17, 0.0 }
 0x1e8   :  { %v380_v59 = vmax.f32 %v351_v21, 0.0 }
 0x1e9   :  { %v391_v60 = vpack.c.bf16 %v379_v57, %v377_v56 }
 0x1ea   :  { %v392_v61 = vpack.c.bf16 %v380_v59, %v378_v58  ;;  %v354_v62 = vpop.f32.mrb[12].mxu1 }
 0x1eb   :  { %v355_v63 = vadd.f32 %v354_v62, %v640_v48  ;;  %v356_v1 = vpop.f32.mrb[13].mxu1 }
 0x1ec   :  { %v357_v26 = vadd.f32 %v356_v1, %v640_v48  ;;  %v358_v4 = vpop.f32.mrb[14].mxu1  ;;  %399 = vmatprep.subr.bf16.mxu0 %v392_v61 }
 0x1ed   :  { %v359_v5 = vadd.f32 %v358_v4, %v643_v53  ;;  %v360_v6 = vpop.f32.mrb[15].mxu1  ;;  %400 = vmatpush1.bf16.msra.mxu0 %v391_v60  ;;  %v381_v9 = vmax.f32 %v355_v63, 0.0 }
 0x1ee   :  { %v361_v37 = vadd.f32 %v360_v6, %v643_v53  ;;  %v382_v11 = vmax.f32 %v357_v26, 0.0 }
 0x1ef   :  { %v383_v10 = vmax.f32 %v359_v5, 0.0 }
 0x1f0   :  { %v384_v12 = vmax.f32 %v361_v37, 0.0 }
 0x1f1   :  { %v393_v14 = vpack.c.bf16 %v383_v10, %v381_v9 }
 0x1f2   :  { %v394_v15 = vpack.c.bf16 %v384_v12, %v382_v11  ;;  %v364_v18 = vpop.f32.mrb[16].mxu1 }
 0x1f3   :  { %v365_v19 = vadd.f32 %v364_v18, %v648_v0  ;;  %v366_v20 = vpop.f32.mrb[17].mxu1 }
 0x1f4   :  { %v367_v48 = vadd.f32 %v366_v20, %v648_v0  ;;  %v368_v22 = vpop.f32.mrb[18].mxu1  ;;  %401 = vmatprep.subr.bf16.mxu0 %v394_v15 }
 0x1f5   :  { %v369_v23 = vadd.f32 %v368_v22, %v651_v7  ;;  %v370_v24 = vpop.f32.mrb[19].mxu1  ;;  %402 = vmatpush1.bf16.msra.mxu0 %v393_v14  ;;  %v385_v27 = vmax.f32 %v365_v19, 0.0 }
 0x1f6   :  { %v371_v53 = vadd.f32 %v370_v24, %v651_v7  ;;  %v386_v3 = vmax.f32 %v367_v48, 0.0 }
 0x1f7   :  { %v387_v29 = vmax.f32 %v369_v23, 0.0 }
 0x1f8   :  { %v388_v30 = vmax.f32 %v371_v53, 0.0 }
 0x1f9   :  { %v395_v8 = vpack.c.bf16 %v387_v29, %v385_v27 }
 0x1fa   :  { %v396_v32 = vpack.c.bf16 %v388_v30, %v386_v3 }
 0x1fc   :  { %403 = vmatprep.subr.bf16.mxu0 %v396_v32 }
 0x1fd   :  { %404 = vmatpush1.bf16.msra.mxu0 %v395_v8 }
 0x200   :  { %481 = vmatmul.mubr.msk.bf16.vlgmr.msra.gmra.mrb[16].mxu0 %vm236_vm1, %v662_v25 }
 0x2d3   :  { %v431_v0 = vpop.f32.mrb[16].mxu0 }
 0x2d4   :  { %v432_v33 = vadd.f32 %v431_v0, %v681_v28  ;;  %v433_v13 = vpop.f32.mrb[17].mxu0 }
 0x2d5   :  { %v434_v2 = vadd.f32 %v433_v13, %v681_v28  ;;  %v435_v7 = vpop.f32.mrb[18].mxu0 }
 0x2d6   :  { %441 = vst [vmem:[#allocation2 + $0x20] sm:$0xff] %v432_v33  ;;  %v436_v16 = vadd.f32 %v435_v7, %v684_v31  ;;  %v437_v34 = vpop.f32.mrb[19].mxu0 }
 0x2d7   :  { %442 = vst [vmem:[#allocation2 + $0x28] sm:$0xff] %v434_v2  ;;  %v438_v35 = vadd.f32 %v437_v34, %v684_v31 }
 0x2d8   :  { %443 = vst [vmem:[#allocation2 + $0x30] sm:$0xff] %v436_v16 }
 0x2d9   :  { %444 = vst [vmem:[#allocation2 + $0x38] sm:$0xff] %v438_v35 }
 0x2da   :  { %510 = shalt.err (!%p507_p4)
}
 0x2db   :  { %s511_s28 = scalar_lea.hbm %s727_s4, 1024 }
 0x2dc   :  { %p512_p5 = scmp.ne.s32.totalorder %s727_s4, %s511_s28  ;;  %p515_p6 = scmp.lt.u32.totalorder %s511_s28, %s727_s4 }
 0x2de   :  { %p517_p7 = pnand %p515_p6, %p512_p5 }
 0x2e0   :  { %520 = shalt.err (!%p517_p7)
}
 0x2e1   :  { %s525_s7 = smov 256   ;;  %s526_s8 = smov 16  }
 0x2e2   :  { %456 = dma.vmem_to_hbm [thread:$0]  %s451_s2, 1024, %s727_s4, [#allocation3], %s525_s7, %s525_s7, %s526_s8  }
 0x2e3   :  { %521 = dma.done.wait [#allocation3], 1024  }
 0x2e4   :  { %522 = vsyncadd [#allocation3], 4294966272 }
 0x2e5   :  { %460 = vsyncpa [#allocation3], 1 }

</bundles_post_ra>
